<compile_context>
chip_gen: v5e
topology: v5e:2x2
jax: 0.10.0
libtpu: 0.0.40
codegen_flags: <defaults>
</compile_context>

<pallas_src>
import jax
import jax.numpy as jnp
from jax.experimental import pallas as pl
from jax.experimental.pallas import tpu as pltpu


def _round_up(n, m):
    return (n + m - 1) // m * m


def _pad2(a, rows, cols):
    pr, pc = rows - a.shape[0], cols - a.shape[1]
    return jnp.pad(a, ((0, pr), (0, pc))) if (pr or pc) else a


# ---------------------------------------------------------------------------
# Kernels.  Grid = (M tiles, K tiles); K (= D_in) is the trailing reduction
# axis.  y = x @ W^T + b accumulates in a (tm, Dp) f32 VMEM scratch; the LoRA
# update runs once per M-tile in the k == last finalize.
# ---------------------------------------------------------------------------
def _lora_merged_kernel(x_ref, wt_ref, b_ref, md_ref, o_ref, acc_ref):
    k = pl.program_id(1)

    @pl.when(k == 0)
    def _():
        # Seed the accumulator with the (row-broadcast) bias so the finalize
        # needs no separate bias add.
        acc_ref[...] = jnp.zeros_like(acc_ref) + b_ref[...]

    acc_ref[...] += jnp.dot(
        x_ref[...], wt_ref[...], preferred_element_type=jnp.float32
    )

    @pl.when(k == pl.num_programs(1) - 1)
    def _():
        y = acc_ref[...]                                    # (tm, Dp) f32
        delta = jnp.dot(                                    # y @ (alpha*Wa@Wb)
            y.astype(md_ref.dtype), md_ref[...],
            preferred_element_type=jnp.float32,
        )
        o_ref[...] = (y + delta).astype(o_ref.dtype)


def _lora_factored_kernel(x_ref, wt_ref, b_ref, wa_ref, wb_ref, o_ref, acc_ref):
    k = pl.program_id(1)

    @pl.when(k == 0)
    def _():
        acc_ref[...] = jnp.zeros_like(acc_ref) + b_ref[...]

    acc_ref[...] += jnp.dot(
        x_ref[...], wt_ref[...], preferred_element_type=jnp.float32
    )

    @pl.when(k == pl.num_programs(1) - 1)
    def _():
        y = acc_ref[...]                                    # (tm, Dp) f32
        t = jnp.dot(                                        # (tm, rp)
            y.astype(wa_ref.dtype), wa_ref[...],
            preferred_element_type=jnp.float32,
        )
        delta = jnp.dot(                                    # (tm, Dp)
            t.astype(wb_ref.dtype), wb_ref[...],
            preferred_element_type=jnp.float32,
        )
        o_ref[...] = (y + delta).astype(o_ref.dtype)


def linear_with_lora(
    x, w, b, w_a, w_b, alpha,
    *, tm=128, tk=256, compute_dtype=None, lora_mode="auto",
    vmem_limit_bytes=None,
):
    """out = (x @ w.T + b) + alpha * ((x @ w.T + b) @ w_a) @ w_b."""
    B, D_in = x.shape
    D_out, D_in_w = w.shape
    assert D_in_w == D_in, "weight must be (out_features, in_features)"
    # LoRA is applied to the linear *output* in the reference module.
    assert D_in == D_out, "LinearWithLoRA requires in_features == out_features"
    rank = w_a.shape[1]
    assert w_a.shape == (D_in, rank) and w_b.shape == (rank, D_out)

    out_dtype = x.dtype
    if compute_dtype is None:
        compute_dtype = x.dtype

    # Tile sizes clamped to the (zero-padded) problem; lane-dense output.
    tm = max(8, min(tm, _round_up(B, 8)))
    tk = max(128, min(tk, _round_up(D_in, 128)))
    Bp = _round_up(B, tm)
    Kp = _round_up(D_in, tk)
    Dp = _round_up(D_out, 128)
    rp = _round_up(max(rank, 128), 128)

    if lora_mode == "auto":
        # Merged dense delta wins while Dp*Dp <= 2*rp*Dp of MXU work.
        lora_mode = "merged" if Dp <= 2 * rp else "factored"
    assert lora_mode in ("merged", "factored")

    # Host-side folds (batch-independent, done once outside the kernel):
    # pre-transposed weight, 2-D bias, alpha folded into the LoRA operand(s).
    x_p = _pad2(x.astype(compute_dtype), Bp, Kp)
    wt_p = _pad2(w.T.astype(compute_dtype), Kp, Dp)           # (Kp, Dp)
    b_p = _pad2(b.reshape(1, D_out).astype(jnp.float32), 1, Dp)

    grid = (Bp // tm, Kp // tk)
    bytes_io = (
        x_p.size * x_p.dtype.itemsize
        + wt_p.size * wt_p.dtype.itemsize
        + b_p.size * b_p.dtype.itemsize
        + Bp * Dp * jnp.dtype(out_dtype).itemsize
    )

    if lora_mode == "merged":
        m_delta = (
            float(alpha) * (w_a.astype(jnp.float32) @ w_b.astype(jnp.float32))
        ).astype(compute_dtype)
        md_p = _pad2(m_delta, Dp, Dp)
        kernel = _lora_merged_kernel
        lora_operands = (md_p,)
        lora_specs = [pl.BlockSpec((Dp, Dp), lambda i, k: (0, 0))]
        lora_flops = 2 * Bp * Dp * Dp
        bytes_io += md_p.size * md_p.dtype.itemsize
    else:
        wa_p = _pad2((float(alpha) * w_a).astype(compute_dtype), Dp, rp)
        wb_p = _pad2(w_b.astype(compute_dtype), rp, Dp)
        kernel = _lora_factored_kernel
        lora_operands = (wa_p, wb_p)
        lora_specs = [
            pl.BlockSpec((Dp, rp), lambda i, k: (0, 0)),
            pl.BlockSpec((rp, Dp), lambda i, k: (0, 0)),
        ]
        lora_flops = 2 * Bp * Dp * rp + 2 * Bp * rp * Dp
        bytes_io += (
            wa_p.size * wa_p.dtype.itemsize + wb_p.size * wb_p.dtype.itemsize
        )

    cost = pl.CostEstimate(
        flops=2 * Bp * Kp * Dp + lora_flops,
        transcendentals=0,
        bytes_accessed=bytes_io,
    )

    out_p = pl.pallas_call(
        kernel,
        out_shape=jax.ShapeDtypeStruct((Bp, Dp), out_dtype),
        grid_spec=pltpu.PrefetchScalarGridSpec(
            num_scalar_prefetch=0,
            grid=grid,
            in_specs=[
                pl.BlockSpec((tm, tk), lambda i, k: (i, k)),   # x tile
                pl.BlockSpec((tk, Dp), lambda i, k: (k, 0)),   # W^T K-tile
                pl.BlockSpec((1, Dp), lambda i, k: (0, 0)),    # bias (resident)
                *lora_specs,                                   # LoRA operand(s)
            ],
            out_specs=pl.BlockSpec((tm, Dp), lambda i, k: (i, 0)),
            scratch_shapes=[pltpu.VMEM((tm, Dp), jnp.float32)],
        ),
        compiler_params=pltpu.CompilerParams(
            dimension_semantics=("parallel", "arbitrary"),
            vmem_limit_bytes=vmem_limit_bytes,
        ),
        cost_estimate=cost,
    )(x_p, wt_p, b_p, *lora_operands)

    return out_p[:B, :D_out]


if __name__ == "__main__":
    # Small shapes consistent with the module: in_features == out_features == 32.
    B, D, RANK, ALPHA = 8, 32, 4, 2.0

    key = jax.random.PRNGKey(0)
    kx, kw, kb, ka, kbb = jax.random.split(key, 5)

    x = jax.random.normal(kx, (B, D), dtype=jnp.float32)
    # nn.Linear params (synthetic init; shapes match nn.Linear(D, D)).
    w = jax.random.normal(kw, (D, D), dtype=jnp.float32) * 0.1
    b = jax.random.normal(kb, (D,), dtype=jnp.float32) * 0.1
    # LoRALayer init is W_a = randn/sqrt(rank), W_b = zeros; a non-zero W_b is
    # used here so the LoRA path is actually exercised numerically.
    w_a = jax.random.normal(ka, (D, RANK), dtype=jnp.float32) / jnp.sqrt(
        jnp.float32(RANK)
    )
    w_b = jax.random.normal(kbb, (RANK, D), dtype=jnp.float32) * 0.1

    # Pure-JAX reference (exact PyTorch forward semantics).
    y_ref = x @ w.T + b
    ref = y_ref + (ALPHA * y_ref @ w_a) @ w_b

    # f32 path (auto -> merged delta at this size).
    out = jax.block_until_ready(linear_with_lora(x, w, b, w_a, w_b, ALPHA))
    assert out.shape == (B, D)
    assert jnp.allclose(out, ref, atol=1e-2, rtol=1e-2), float(
        jnp.max(jnp.abs(out - ref))
    )

    # Factored (rank-padded) path, used automatically for large D_out.
    out_fac = jax.block_until_ready(
        linear_with_lora(x, w, b, w_a, w_b, ALPHA, lora_mode="factored")
    )
    assert jnp.allclose(out_fac, ref, atol=1e-2, rtol=1e-2), float(
        jnp.max(jnp.abs(out_fac - ref))
    )

    # bf16-matmul path (f32 accumulation) per v6e/v7x performance guidance.
    out_bf16 = jax.block_until_ready(
        linear_with_lora(x, w, b, w_a, w_b, ALPHA, compute_dtype=jnp.bfloat16)
    )
    assert out_bf16.shape == (B, D)
    assert jnp.allclose(out_bf16, ref, atol=3e-2, rtol=3e-2), float(
        jnp.max(jnp.abs(out_bf16 - ref))
    )

    print("KERNEL_OK")
</pallas_src>

<mosaic_0001>
module attributes {stable_mosaic.version = 11 : i64} {
  func.func @_lora_merged_kernel(%arg0: i32, %arg1: i32, %arg2: memref<8x128xf32, #tpu.memory_space<vmem>>, %arg3: memref<128x128xf32, #tpu.memory_space<vmem>>, %arg4: memref<1x128xf32, #tpu.memory_space<vmem>>, %arg5: memref<128x128xf32, #tpu.memory_space<vmem>>, %arg6: memref<8x128xf32, #tpu.memory_space<vmem>>, %arg7: memref<8x128xf32, #tpu.memory_space<vmem>>) attributes {dimension_semantics = [#tpu.dimension_semantics<parallel>, #tpu.dimension_semantics<arbitrary>], iteration_bounds = array<i64: 1, 1>, scalar_prefetch = 0 : i64, scratch_operands = 1 : i64, tpu.core_type = #tpu.core_type<tc>, window_params = [{transform_indices = @transform_0, window_bounds = array<i64: 8, 128>}, {transform_indices = @transform_1, window_bounds = array<i64: 128, 128>}, {pipeline_mode = #tpu.pipeline_mode<synchronous>, transform_indices = @transform_2, window_bounds = array<i64: 1, 128>}, {pipeline_mode = #tpu.pipeline_mode<synchronous>, transform_indices = @transform_3, window_bounds = array<i64: 128, 128>}, {transform_indices = @transform_4, window_bounds = array<i64: 8, 128>}]} {
    %c0_i32 = arith.constant 0 : i32
    %0 = arith.cmpi eq, %arg1, %c0_i32 : i32
    %1 = arith.extui %0 : i1 to i32
    %c0_i32_0 = arith.constant 0 : i32
    %2 = arith.cmpi ne, %1, %c0_i32_0 : i32
    scf.if %2 {
      %cst_10 = arith.constant 0.000000e+00 : f32
      %12 = vector.broadcast %cst_10 : f32 to vector<8x128xf32>
      %c0_11 = arith.constant 0 : index
      %c0_12 = arith.constant 0 : index
      %13 = vector.load %arg4[%c0_11, %c0_12] : memref<1x128xf32, #tpu.memory_space<vmem>>, vector<1x128xf32>
      %14 = vector.broadcast %13 : vector<1x128xf32> to vector<8x128xf32>
      %15 = arith.addf %12, %14 : vector<8x128xf32>
      %c0_13 = arith.constant 0 : index
      %c0_14 = arith.constant 0 : index
      %16 = vector.load %arg7[%c0_13, %c0_14] : memref<8x128xf32, #tpu.memory_space<vmem>>, vector<8x128xf32>
      tpu.vector_store %arg7[%c0_13, %c0_14], %15 {strides = array<i32>} : memref<8x128xf32, #tpu.memory_space<vmem>>, vector<8x128xf32>,
    } else {
    }
    %c0 = arith.constant 0 : index
    %c0_1 = arith.constant 0 : index
    %3 = vector.load %arg7[%c0, %c0_1] : memref<8x128xf32, #tpu.memory_space<vmem>>, vector<8x128xf32>
    %c0_2 = arith.constant 0 : index
    %c0_3 = arith.constant 0 : index
    %4 = vector.load %arg2[%c0_2, %c0_3] : memref<8x128xf32, #tpu.memory_space<vmem>>, vector<8x128xf32>
    %c0_4 = arith.constant 0 : index
    %c0_5 = arith.constant 0 : index
    %5 = vector.load %arg3[%c0_4, %c0_5] : memref<128x128xf32, #tpu.memory_space<vmem>>, vector<128x128xf32>
    %cst = arith.constant dense<0.000000e+00> : vector<8x128xf32>
    %6 = tpu.matmul %4, %5, %cst {dimension_numbers = #tpu.dot_dimension_numbers<[1], [0], [0], [1], [0, 0, 1, 1], [], []>} : vector<8x128xf32>, vector<128x128xf32>, vector<8x128xf32> -> vector<8x128xf32>
    %7 = arith.addf %3, %6 : vector<8x128xf32>
    %c0_6 = arith.constant 0 : index
    %c0_7 = arith.constant 0 : index
    %8 = vector.load %arg7[%c0_6, %c0_7] : memref<8x128xf32, #tpu.memory_space<vmem>>, vector<8x128xf32>
    tpu.vector_store %arg7[%c0_6, %c0_7], %7 {strides = array<i32>} : memref<8x128xf32, #tpu.memory_space<vmem>>, vector<8x128xf32>,
    %c0_i32_8 = arith.constant 0 : i32
    %9 = arith.cmpi eq, %arg1, %c0_i32_8 : i32
    %10 = arith.extui %9 : i1 to i32
    %c0_i32_9 = arith.constant 0 : i32
    %11 = arith.cmpi ne, %10, %c0_i32_9 : i32
    scf.if %11 {
      %c0_10 = arith.constant 0 : index
      %c0_11 = arith.constant 0 : index
      %12 = vector.load %arg7[%c0_10, %c0_11] : memref<8x128xf32, #tpu.memory_space<vmem>>, vector<8x128xf32>
      %c0_12 = arith.constant 0 : index
      %c0_13 = arith.constant 0 : index
      %13 = vector.load %arg5[%c0_12, %c0_13] : memref<128x128xf32, #tpu.memory_space<vmem>>, vector<128x128xf32>
      %cst_14 = arith.constant dense<0.000000e+00> : vector<8x128xf32>
      %14 = tpu.matmul %12, %13, %cst_14 {dimension_numbers = #tpu.dot_dimension_numbers<[1], [0], [0], [1], [0, 0, 1, 1], [], []>} : vector<8x128xf32>, vector<128x128xf32>, vector<8x128xf32> -> vector<8x128xf32>
      %15 = arith.addf %12, %14 : vector<8x128xf32>
      %c0_15 = arith.constant 0 : index
      %c0_16 = arith.constant 0 : index
      %16 = vector.load %arg6[%c0_15, %c0_16] : memref<8x128xf32, #tpu.memory_space<vmem>>, vector<8x128xf32>
      tpu.vector_store %arg6[%c0_15, %c0_16], %15 {strides = array<i32>} : memref<8x128xf32, #tpu.memory_space<vmem>>, vector<8x128xf32>,
    } else {
    }
    return
  }
  func.func @transform_0(%arg0: i32, %arg1: i32) -> (i32, i32) {
    %c0_i32 = arith.constant 0 : i32
    return %arg0, %arg1 : i32, i32
  }
  func.func @transform_1(%arg0: i32, %arg1: i32) -> (i32, i32) {
    %c0_i32 = arith.constant 0 : i32
    %c0_i32_0 = arith.constant 0 : i32
    return %arg1, %c0_i32 : i32, i32
  }
  func.func @transform_2(%arg0: i32, %arg1: i32) -> (i32, i32) {
    %c0_i32 = arith.constant 0 : i32
    %c0_i32_0 = arith.constant 0 : i32
    %c0_i32_1 = arith.constant 0 : i32
    return %c0_i32, %c0_i32_0 : i32, i32
  }
  func.func @transform_3(%arg0: i32, %arg1: i32) -> (i32, i32) {
    %c0_i32 = arith.constant 0 : i32
    %c0_i32_0 = arith.constant 0 : i32
    %c0_i32_1 = arith.constant 0 : i32
    return %c0_i32, %c0_i32_0 : i32, i32
  }
  func.func @transform_4(%arg0: i32, %arg1: i32) -> (i32, i32) {
    %c0_i32 = arith.constant 0 : i32
    %c0_i32_0 = arith.constant 0 : i32
    return %arg0, %c0_i32 : i32, i32
  }
}

</mosaic_0001>

<bundles_post_ra>
// kernel: tpu_custom_call.1
= control target key start
LH: loop header
LB: loop body
LE: loop exit
PB: predicated region body
PF: predicated region fallthrough
CT: control target
= control target key end

     0   :  { %9 = vsyncpa [#allocation4], 0  ;;  %s328_s0 = inlined_call_operand.hbm [shape: f32[8,128], index: 0, kind: input, shape index: {}]   ;;  %s329_s1 = inlined_call_operand.hbm [shape: f32[128,128], index: 1, kind: input, shape index: {}]   ;;  %s330_s2 = inlined_call_operand.vmem [shape: f32[1,128], index: 2, kind: input, shape index: {}]   ;;  %s331_s3 = inlined_call_operand.hbm [shape: f32[128,128], index: 3, kind: input, shape index: {}]   ;;  %s332_s4 = inlined_call_operand.hbm [shape: f32[8,128], index: 4, kind: output, shape index: {}]  }
   0x1   :  { %10 = vsyncpa [#allocation7], 0  ;;  %s27_s17 = sshll.u32 %s329_s1, 4  ;;  %s28_s17 = int_to_ptr.hbm [resolvable:$true] %s27_s17 }
   0x2   :  { %11 = vsyncpa [#allocation5], 0  ;;  %s282_s18 = smov [#allocation6]   ;;  %s17_s22 = sshll.u32 %s328_s0, 4  ;;  %s18_s22 = int_to_ptr.hbm [resolvable:$true] %s17_s22 }
   0x3   :  { %s29_s19 = sshll.u32 %s282_s18, 4  ;;  %s283_s23 = smov 128   ;;  %s30_s19 = int_to_ptr.vmem [resolvable:$true] %s29_s19 }
   0x4   :  { %s284_s24 = smov 8   ;;  %s285_s25 = smov [#allocation3]  }
   0x5   :  { %35 = dma.hbm_to_vmem [thread:$0]  %s28_s17, 2048, %s30_s19, [#allocation7], %s283_s23, %s283_s23, %s284_s24  }
   0x6   :  { %s19_s26 = sshll.u32 %s285_s25, 4  ;;  %s42_s29 = sshll.u32 %s331_s3, 4  ;;  %s20_s26 = int_to_ptr.vmem [resolvable:$true] %s19_s26  ;;  %s43_s29 = int_to_ptr.hbm [resolvable:$true] %s42_s29 }
   0x7   :  { %22 = dma.hbm_to_vmem [thread:$0]  %s18_s22, 128, %s20_s26, [#allocation4]  }
   0x8   :  { %s286_s1 = smov [#allocation8]  }
   0x9   :  { %s44_s30 = sshll.u32 %s286_s1, 4  ;;  %s45_s30 = int_to_ptr.vmem [resolvable:$true] %s44_s30 }
   0xa   :  { %50 = dma.hbm_to_vmem [thread:$0]  %s43_s29, 2048, %s45_s30, [#allocation7], %s283_s23, %s283_s23, %s284_s24  }
   0xb   :  { %276 = dma.done.wait [#allocation4], 128  }
   0xc   :  { %277 = vsyncadd [#allocation4], 4294967168 }
   0xd   :  { %278 = dma.done.wait [#allocation7], 4096  }
   0xe   :  { %279 = vsyncadd [#allocation7], 4294963200  ;;  %v90_v0 = vld [vmem:[#allocation6 + $0x78] sm:$0xff]  ;;  %v89_v1 = vld [vmem:[#allocation6 + $0x70] sm:$0xff]  ;;  %s287_s5 = smov [#allocation9]   ;;  %s162_s9 = sshll.u32 %s332_s4, 4  ;;  %s163_s9 = int_to_ptr.hbm [resolvable:$true] %s162_s9 }
   0xf   :  { %91 = vmatpush.msra.mxu0 %v90_v0  ;;  %v88_v2 = vld [vmem:[#allocation6 + $0x68] sm:$0xff]  ;;  %v87_v3 = vld [vmem:[#allocation6 + $0x60] sm:$0xff]  ;;  %v132_v4 = vld [vmem:[#allocation8 + $0x78] sm:$0xff]  ;;  %s160_s6 = sshll.u32 %s287_s5, 4  ;;  %s161_s6 = int_to_ptr.vmem [resolvable:$true] %s160_s6 }
  0x10   :  { %v86_v5 = vld [vmem:[#allocation6 + $0x58] sm:$0xff]  ;;  %133 = vmatpush.msra.mxu1 %v132_v4  ;;  %v131_v6 = vld [vmem:[#allocation8 + $0x70] sm:$0xff]  ;;  %v130_v7 = vld [vmem:[#allocation8 + $0x68] sm:$0xff] }
  0x11   :  { %92 = vmatpush.msra.mxu0 %v89_v1  ;;  %v85_v8 = vld [vmem:[#allocation6 + $0x50] sm:$0xff]  ;;  %v129_v9 = vld [vmem:[#allocation8 + $0x60] sm:$0xff]  ;;  %v84_v10 = vld [vmem:[#allocation6 + $0x48] sm:$0xff] }
  0x12   :  { %134 = vmatpush.msra.mxu1 %v131_v6  ;;  %v128_v11 = vld [vmem:[#allocation8 + $0x58] sm:$0xff]  ;;  %v83_v12 = vld [vmem:[#allocation6 + $0x40] sm:$0xff]  ;;  %v127_v13 = vld [vmem:[#allocation8 + $0x50] sm:$0xff] }
  0x13   :  { %93 = vmatpush.msra.mxu0 %v88_v2  ;;  %v82_v14 = vld [vmem:[#allocation6 + $0x38] sm:$0xff]  ;;  %v126_v15 = vld [vmem:[#allocation8 + $0x48] sm:$0xff]  ;;  %v81_v16 = vld [vmem:[#allocation6 + $0x30] sm:$0xff] }
  0x14   :  { %135 = vmatpush.msra.mxu1 %v130_v7  ;;  %v125_v17 = vld [vmem:[#allocation8 + $0x40] sm:$0xff]  ;;  %v80_v18 = vld [vmem:[#allocation6 + $0x28] sm:$0xff]  ;;  %v124_v19 = vld [vmem:[#allocation8 + $0x38] sm:$0xff] }
  0x15   :  { %94 = vmatpush.msra.mxu0 %v87_v3  ;;  %v79_v20 = vld [vmem:[#allocation6 + $0x20] sm:$0xff]  ;;  %v123_v21 = vld [vmem:[#allocation8 + $0x30] sm:$0xff]  ;;  %v78_v22 = vld [vmem:[#allocation6 + $0x18] sm:$0xff] }
  0x16   :  { %136 = vmatpush.msra.mxu1 %v129_v9  ;;  %v122_v23 = vld [vmem:[#allocation8 + $0x28] sm:$0xff]  ;;  %v77_v24 = vld [vmem:[#allocation6 + $0x10] sm:$0xff]  ;;  %v121_v25 = vld [vmem:[#allocation8 + $0x20] sm:$0xff] }
  0x17   :  { %95 = vmatpush.msra.mxu0 %v86_v5  ;;  %v76_v26 = vld [vmem:[#allocation6 + $0x8] sm:$0xff]  ;;  %v120_v27 = vld [vmem:[#allocation8 + $0x18] sm:$0xff]  ;;  %v75_v28 = vld [vmem:[#allocation6] sm:$0xff] }
  0x18   :  { %137 = vmatpush.msra.mxu1 %v128_v11  ;;  %v74_v29 = vld [vmem:[#allocation3] sm:$0xff]  ;;  %v119_v30 = vld [vmem:[#allocation8 + $0x10] sm:$0xff]  ;;  %v118_v31 = vld [vmem:[#allocation8 + $0x8] sm:$0xff] }
  0x19   :  { %96 = vmatpush.msra.mxu0 %v85_v8  ;;  %v117_v32 = vld [vmem:[#allocation8] sm:$0xff]  ;;  %v179_v33 = vld [vmem:[%s330_s2] ss:$0 sm:$0xff] }
  0x1a   :  { %138 = vmatpush.msra.mxu1 %v127_v13 }
  0x1b   :  { %97 = vmatpush.msra.mxu0 %v84_v10 }
  0x1c   :  { %139 = vmatpush.msra.mxu1 %v126_v15 }
  0x1d   :  { %98 = vmatpush.msra.mxu0 %v83_v12 }
  0x1e   :  { %140 = vmatpush.msra.mxu1 %v125_v17 }
  0x1f   :  { %99 = vmatpush.msra.mxu0 %v82_v14 }
  0x20   :  { %141 = vmatpush.msra.mxu1 %v124_v19 }
  0x21   :  { %100 = vmatpush.msra.mxu0 %v81_v16 }
  0x22   :  { %142 = vmatpush.msra.mxu1 %v123_v21 }
  0x23   :  { %101 = vmatpush.msra.mxu0 %v80_v18 }
  0x24   :  { %143 = vmatpush.msra.mxu1 %v122_v23 }
  0x25   :  { %102 = vmatpush.msra.mxu0 %v79_v20 }
  0x26   :  { %144 = vmatpush.msra.mxu1 %v121_v25 }
  0x27   :  { %103 = vmatpush.msra.mxu0 %v78_v22 }
  0x28   :  { %145 = vmatpush.msra.mxu1 %v120_v27 }
  0x29   :  { %104 = vmatpush.msra.mxu0 %v77_v24 }
  0x2a   :  { %146 = vmatpush.msra.mxu1 %v119_v30 }
  0x2b   :  { %105 = vmatpush.msra.mxu0 %v76_v26 }
  0x2c   :  { %147 = vmatpush.msra.mxu1 %v118_v31 }
  0x2d   :  { %106 = vmatpush.msra.mxu0 %v75_v28 }
  0x2e   :  { %107 = vmatmul.f32.vlgmr.msra.gmra.mxu0 %v74_v29  ;;  %148 = vmatpush.msra.mxu1 %v117_v32 }
  0xab   :  { %v108_v34 = vpop.f32.mrf.mxu0 }
  0xac   :  { %v111_v35 = vadd.f32 %v179_v33, %v108_v34 }
  0xae   :  { %149 = vmatmul.f32.vlgmr.msra.gmra.mxu1 %v111_v35 }
 0x12b   :  { %v150_v36 = vpop.f32.mrf.mxu1 }
 0x12c   :  { %v153_v37 = vadd.f32 %v150_v36, %v111_v35 }
 0x12e   :  { %154 = vst [vmem:[#allocation9] sm:$0xff] %v153_v37 }
 0x12f   :  { %165 = dma.vmem_to_hbm [thread:$0]  %s161_s6, 128, %s163_s9, [#allocation5]  }
 0x130   :  { %280 = dma.done.wait [#allocation5], 128  }
 0x131   :  { %281 = vsyncadd [#allocation5], 4294967168 }
 0x132   :  { %170 = vsyncpa [#allocation4], 1 }
 0x133   :  { %171 = vsyncpa [#allocation7], 1 }
 0x134   :  { %172 = vsyncpa [#allocation5], 1 }

</bundles_post_ra>
